<compile_context>
chip_gen: v5e
topology: v5e:2x2
jax: 0.10.0
libtpu: 0.0.40
codegen_flags: <defaults>
</compile_context>

<pallas_src>
import functools

import jax
import jax.numpy as jnp
from jax.experimental import pallas as pl
from jax.experimental.pallas import tpu as pltpu


def _outconv_kernel(x_ref, w_ref, b_ref, o_ref):
    # x_ref: (Cin, THW)   w_ref: (Cout, Cin)   b_ref: (Cout, 1)   o_ref: (Cout, THW)
    acc = jnp.dot(w_ref[...], x_ref[...], preferred_element_type=jnp.float32)
    o_ref[...] = (acc + b_ref[...]).astype(o_ref.dtype)


@functools.partial(jax.jit, static_argnames=("tile_hw",))
def outconv(x_nchw, weight, bias, *, tile_hw=2048):
    """1x1 Conv2d, equivalent to nn.Conv2d(Cin, Cout, kernel_size=1).

    Args:
      x_nchw: (N, Cin, H, W) float32
      weight: (Cout, Cin, 1, 1) float32  (PyTorch conv weight layout)
      bias:   (Cout,) float32
      tile_hw: spatial tile width (lane dim). Large (1-2K) to amortize
        per-grid-step overhead; clipped to a multiple of 128 or the full HW.
    Returns:
      (N, Cout, H, W) float32
    """
    N, Cin, H, W = x_nchw.shape
    Cout = weight.shape[0]
    HW = H * W

    # Free reshapes (no data movement in row-major NCHW layout).
    x_flat = x_nchw.reshape(N, Cin, HW)          # (N, Cin, HW)
    w_mat = weight.reshape(Cout, Cin)            # (Cout, Cin)
    b_col = bias.reshape(Cout, 1)                # (Cout, 1)

    # Tile the HW (lane) dimension: full extent if small, else a multiple
    # of 128 so both loads and stores are lane-dense.
    if HW <= tile_hw:
        t_hw = HW
    else:
        t_hw = max((tile_hw // 128) * 128, 128)

    grid = (N, pl.cdiv(HW, t_hw))

    out_flat = pl.pallas_call(
        _outconv_kernel,
        out_shape=jax.ShapeDtypeStruct((N, Cout, HW), x_nchw.dtype),
        grid_spec=pltpu.PrefetchScalarGridSpec(
            num_scalar_prefetch=0,
            grid=grid,
            in_specs=[
                # x: squeeze the batch dim; kernel sees (Cin, t_hw).
                pl.BlockSpec((None, Cin, t_hw), lambda n, j: (n, 0, j)),
                # weight / bias: whole (tiny) arrays, resident every step.
                pl.BlockSpec((Cout, Cin), lambda n, j: (0, 0)),
                pl.BlockSpec((Cout, 1), lambda n, j: (0, 0)),
            ],
            out_specs=pl.BlockSpec((None, Cout, t_hw), lambda n, j: (n, 0, j)),
        ),
        compiler_params=pltpu.CompilerParams(
            dimension_semantics=("parallel", "parallel"),
        ),
    )(x_flat, w_mat, b_col)

    # Free reshape back to NCHW.
    return out_flat.reshape(N, Cout, H, W)


def init_outconv_params(key, in_channels, out_channels):
    """Deterministic init matching nn.Conv2d(in, out, kernel_size=1) shapes."""
    kw, kb = jax.random.split(key)
    fan_in = in_channels * 1 * 1
    bound = 1.0 / jnp.sqrt(fan_in)
    weight = jax.random.uniform(
        kw, (out_channels, in_channels, 1, 1), jnp.float32, -bound, bound
    )
    bias = jax.random.uniform(kb, (out_channels,), jnp.float32, -bound, bound)
    return weight, bias


def _reference(x, weight, bias):
    Cout, Cin = weight.shape[0], weight.shape[1]
    return (
        jnp.einsum("nchw,oc->nohw", x, weight.reshape(Cout, Cin))
        + bias.reshape(1, Cout, 1, 1)
    )


if __name__ == "__main__":
    key = jax.random.PRNGKey(0)
    k_x, k_p, k_x2 = jax.random.split(key, 3)

    # Main test: small shapes consistent with the module.
    N, Cin, Cout, H, W = 2, 4, 2, 16, 16
    x = jax.random.normal(k_x, (N, Cin, H, W), jnp.float32)
    weight, bias = init_outconv_params(k_p, Cin, Cout)

    out = outconv(x, weight, bias)
    out = jax.block_until_ready(out)

    ref = _reference(x, weight, bias)
    assert out.shape == (N, Cout, H, W)
    assert jnp.allclose(out, ref, atol=1e-5, rtol=1e-5)

    # Ragged-tail test: HW not a multiple of the tile; exercised via a small
    # explicit tile so the edge block is masked (no padded copy materialized).
    x2 = jax.random.normal(k_x2, (1, Cin, 10, 30), jnp.float32)  # HW = 300
    out2 = jax.block_until_ready(outconv(x2, weight, bias, tile_hw=128))
    ref2 = _reference(x2, weight, bias)
    assert out2.shape == (1, Cout, 10, 30)
    assert jnp.allclose(out2, ref2, atol=1e-5, rtol=1e-5)

    print("KERNEL_OK")
</pallas_src>

<mosaic_0001>
module attributes {stable_mosaic.version = 11 : i64} {
  func.func @_outconv_kernel(%arg0: i32, %arg1: i32, %arg2: memref<1x4x256xf32, #tpu.memory_space<vmem>>, %arg3: memref<2x4xf32, #tpu.memory_space<vmem>>, %arg4: memref<2x1xf32, #tpu.memory_space<vmem>>, %arg5: memref<1x2x256xf32, #tpu.memory_space<vmem>>) attributes {dimension_semantics = [#tpu.dimension_semantics<parallel>, #tpu.dimension_semantics<parallel>], iteration_bounds = array<i64: 2, 1>, scalar_prefetch = 0 : i64, scratch_operands = 0 : i64, tpu.core_type = #tpu.core_type<tc>, window_params = [{transform_indices = @transform_0, window_bounds = array<i64: 1, 4, 256>}, {pipeline_mode = #tpu.pipeline_mode<synchronous>, transform_indices = @transform_1, window_bounds = array<i64: 2, 4>}, {pipeline_mode = #tpu.pipeline_mode<synchronous>, transform_indices = @transform_2, window_bounds = array<i64: 2, 1>}, {transform_indices = @transform_3, window_bounds = array<i64: 1, 2, 256>}]} {
    %c0 = arith.constant 0 : index
    %c0_0 = arith.constant 0 : index
    %0 = vector.load %arg3[%c0, %c0_0] : memref<2x4xf32, #tpu.memory_space<vmem>>, vector<2x4xf32>
    %c0_1 = arith.constant 0 : index
    %c0_2 = arith.constant 0 : index
    %c0_3 = arith.constant 0 : index
    %1 = vector.load %arg2[%c0_1, %c0_2, %c0_3] : memref<1x4x256xf32, #tpu.memory_space<vmem>>, vector<1x4x256xf32>
    %2 = vector.shape_cast %1 : vector<1x4x256xf32> to vector<4x256xf32>
    %cst = arith.constant dense<0.000000e+00> : vector<2x256xf32>
    %3 = tpu.matmul %0, %2, %cst {dimension_numbers = #tpu.dot_dimension_numbers<[1], [0], [0], [1], [0, 0, 1, 1], [], []>} : vector<2x4xf32>, vector<4x256xf32>, vector<2x256xf32> -> vector<2x256xf32>
    %c0_4 = arith.constant 0 : index
    %c0_5 = arith.constant 0 : index
    %4 = vector.load %arg4[%c0_4, %c0_5] : memref<2x1xf32, #tpu.memory_space<vmem>>, vector<2x1xf32>
    %5 = vector.broadcast %4 : vector<2x1xf32> to vector<2x256xf32>
    %6 = arith.addf %3, %5 : vector<2x256xf32>
    %c0_6 = arith.constant 0 : index
    %c0_7 = arith.constant 0 : index
    %c0_8 = arith.constant 0 : index
    %7 = vector.load %arg5[%c0_6, %c0_7, %c0_8] : memref<1x2x256xf32, #tpu.memory_space<vmem>>, vector<1x2x256xf32>
    %8 = vector.shape_cast %7 : vector<1x2x256xf32> to vector<2x256xf32>
    %9 = vector.shape_cast %6 : vector<2x256xf32> to vector<1x2x256xf32>
    tpu.vector_store %arg5[%c0_6, %c0_7, %c0_8], %9 {strides = array<i32>} : memref<1x2x256xf32, #tpu.memory_space<vmem>>, vector<1x2x256xf32>,
    return
  }
  func.func @transform_0(%arg0: i32, %arg1: i32) -> (i32, i32, i32) {
    %c0_i32 = arith.constant 0 : i32
    %c0_i32_0 = arith.constant 0 : i32
    return %arg0, %c0_i32, %arg1 : i32, i32, i32
  }
  func.func @transform_1(%arg0: i32, %arg1: i32) -> (i32, i32) {
    %c0_i32 = arith.constant 0 : i32
    %c0_i32_0 = arith.constant 0 : i32
    %c0_i32_1 = arith.constant 0 : i32
    return %c0_i32, %c0_i32_0 : i32, i32
  }
  func.func @transform_2(%arg0: i32, %arg1: i32) -> (i32, i32) {
    %c0_i32 = arith.constant 0 : i32
    %c0_i32_0 = arith.constant 0 : i32
    %c0_i32_1 = arith.constant 0 : i32
    return %c0_i32, %c0_i32_0 : i32, i32
  }
  func.func @transform_3(%arg0: i32, %arg1: i32) -> (i32, i32, i32) {
    %c0_i32 = arith.constant 0 : i32
    %c0_i32_0 = arith.constant 0 : i32
    return %arg0, %c0_i32, %arg1 : i32, i32, i32
  }
}

</mosaic_0001>

<bundles_post_ra>
// kernel: outconv.1
= control target key start
LH: loop header
LB: loop body
LE: loop exit
PB: predicated region body
PF: predicated region fallthrough
CT: control target
= control target key end

     0   :  { %s453_s12 = smov 0   ;;  %s455_s13 = smov 0   ;;  %s492_s0 = inlined_call_operand.vmem [shape: f32[2,4,256], index: 0, kind: input, shape index: {}]   ;;  %s493_s1 = inlined_call_operand.vmem [shape: f32[2,4], index: 1, kind: input, shape index: {}]   ;;  %s494_s2 = inlined_call_operand.vmem [shape: f32[2,1], index: 2, kind: input, shape index: {}]   ;;  %s495_s3 = inlined_call_operand.vmem [shape: f32[2,2,256], index: 3, kind: output, shape index: {}]  }
   0x1   :  { %s457_s14 = smov 0  }
   0x2 LB: > { %s25_s15 = sadd.s32 1, %s426_s13  ;;  %p369_p0 = scmp.ge.s32.totalorder %s430_s14, 1  ;;  %s430_s14 = sphi %s457_s14, %s13_s14   ;;  %s426_s13 = sphi %s455_s13, %s497_s13   ;;  %s422_s12 = sphi %s453_s12, %s496_s12  }
   0x3   : > { %p27_p1 = scmp.ge.s32.totalorder %s25_s15, 2  ;;  %p158_p2 = scmp.lt.s32.totalorder %s430_s14, 3 }
   0x5   : > { %s499_s15 = smov (%p27_p1, %s25_s15), 0  ;;  %p159_p3 = pnand %p369_p0, %p158_p2 }
   0x6   : > { %p191_p4 = scmp.lt.s32.totalorder (!%p159_p3), %s422_s12, 1 }
   0x7   : > { %162 = sbr.rel (%p159_p3) target bundleno = 157 (0x9d), region = 32 }
   0xc   : > { %v432_v0 = vmov 0   ;;  %v212_v1 = vld [vmem:[%s494_s2] sm:$0x3]  ;;  %s501_s12 = smov (!%p191_p4, %s422_s12), 1  ;;  %vm226_vm0 = vcmask 1043456   ;;  %vm222_vm1 = vcmask 31744  }
   0xd   : > { %407 = vset.pattern.permute.xlu0 %v432_v0  ;;  %s380_s18 = sshll.u32 %s501_s12, 3  ;;  %v210_v3 = vld [vmem:[%s493_s1] sm:$0x3]  ;;  %s381_s24 = sshll.u32 %s501_s12, 2  ;;  %vm274_vm2 = vcmask 1041408  }
   0xe   : > { %215 = vperm.xlu0 %407, %v212_v1   ;;  %s198_s21 = scalar_lea.vmem %s492_s0, %s380_s18  ;;  %s208_s27 = scalar_lea.vmem %s495_s3, %s381_s24 }
   0xf   : > { %v211_v2 = vld [vmem:[%s198_s21] sm:$0xff] }
  0x10   : > { %219 = vst [vmem:[#allocation1] ss:$2 sm:$0xff] %v211_v2 }
  0x17   : > { %v220_v4 = vld.sshfl [vmem:[#allocation1] sm:$0xff pattern:$0x75316420]  ;;  %v221_v5 = vld.sshfl [vmem:[#allocation1 + $0x8] sm:$0xff pattern:$0x75316420] }
  0x18   : > { %374 = vmatpush.msk.msra.mxu0 %vm226_vm0, %v220_v4  ;;  %376 = vmatpush.msk.msra.mxu1 %vm226_vm0, %v221_v5 }
  0x19   : > { %375 = vmatmul.msk.f32.vlgmr.msra.gmra.mxu0 %vm222_vm1, %v210_v3  ;;  %377 = vmatmul.msk.f32.vlgmr.msra.gmra.mxu1 %vm222_vm1, %v210_v3 }
  0x80   : > { %v216_v6 = vpop.permute.xlu0 %215 }
  0x96   : > { %v248_v7 = vpop.f32.mrf.mxu0  ;;  %v268_v8 = vpop.f32.mrf.mxu1 }
  0x97   : > { %v269_v9 = vadd.f32 %v268_v8, %v216_v6  ;;  %v249_v10 = vadd.f32 %v248_v7, %v216_v6 }
  0x99   : > { %v273_v11 = vrot.slane %v269_v9, 6 }
  0x9b   : > { %v275_v12 = vsel %vm274_vm2, %v249_v10, %v273_v11 }
  0x9c   : > { %277 = vst [vmem:[%s208_s27] sm:$0xf] %v275_v12 }
  0x9d PF: > { %s13_s14 = sadd.s32 1, %s430_s14   ;;  %s496_s12 = smov %s426_s13 }
  0x9e   : > { %p10_p5 = scmp.ge.s32.totalorder %s13_s14, 4   ;;  %s497_s13 = smov %s499_s15 }
  0xa0   :  { %12 = sbr.rel (!%p10_p5) target bundleno = 2 (0x2), region = 62 }

</bundles_post_ra>
